<compile_context>
chip_gen: v5e
topology: v5e:2x2
jax: 0.10.0
libtpu: 0.0.40
codegen_flags: <defaults>
</compile_context>

<pallas_src>
import math

import jax
import jax.numpy as jnp
import numpy as np
from jax.experimental import pallas as pl
from jax.experimental.pallas import tpu as pltpu


# ------------------------- model configuration (small) -------------------------
DIM = 32          # args.dim
N_HEADS = 4       # args.n_heads (n_kv_heads defaults to n_heads)
HEAD_DIM = DIM // N_HEADS
SEQ = 8
BATCH = 2

NEG_INF = -1e9


# --------------------------------- kernel --------------------------------------
def attention_kernel(x_ref, wqkv_ref, wo_ref, slopes_ref, o_ref):
    """Whole-problem kernel (no grid — one invocation covers all batches/heads).

    x_ref      : (B*S, D)   VMEM  flattened activations
    wqkv_ref   : (D, 3*D)   VMEM  [Wq^T * 1/sqrt(hd) | Wk^T | Wv^T]  (in x out)
    wo_ref     : (D, D)     VMEM  Wo^T                               (in x out)
    slopes_ref : (H,)       SMEM  per-head ALiBi slopes
    o_ref      : (B*S, D)   VMEM
    """
    x = x_ref[...]                                                     # (B*S, D)
    # One fused QKV projection for every batch row: (B*S, 3*D).  The softmax
    # scale is already folded into the Wq columns, so q comes out pre-scaled.
    qkv = jnp.dot(x, wqkv_ref[...], preferred_element_type=jnp.float32)

    # Head-independent mask pieces, built once from iota (VPU work, no HBM
    # traffic).  Per head only a scalar-mul + add remains.
    qpos = jax.lax.broadcasted_iota(jnp.int32, (SEQ, SEQ), 0)
    kpos = jax.lax.broadcasted_iota(jnp.int32, (SEQ, SEQ), 1)
    rel = (kpos - qpos).astype(jnp.float32)                            # (S, S)
    causal = jnp.where(kpos <= qpos, 0.0, NEG_INF).astype(jnp.float32)
    # TODO(synk): the torch module accepts an arbitrary additive `mask`; this
    # kernel regenerates the standard ALiBi+causal mask in-kernel from slopes
    # (per perf review).  A non-ALiBi mask would need a mask-slab input again.

    # Static Python loops: B*H = 8 iterations, all shapes tiny and static.
    per_batch = []
    for b in range(BATCH):
        r0 = b * SEQ
        heads = []
        for h in range(N_HEADS):
            c = h * HEAD_DIM
            # Per-head operands are slices of projected ACTIVATIONS (never of
            # weight refs); row slices are sublane-aligned (S = 8).
            q_h = qkv[r0:r0 + SEQ, c:c + HEAD_DIM]                      # (S, hd)
            k_h = qkv[r0:r0 + SEQ, DIM + c:DIM + c + HEAD_DIM]          # (S, hd)
            v_h = qkv[r0:r0 + SEQ, 2 * DIM + c:2 * DIM + c + HEAD_DIM]  # (S, hd)

            # Contract on the last dim of BOTH operands: MXU consumes K
            # untransposed (no per-head XLU transpose).
            s = jax.lax.dot_general(
                q_h, k_h,
                dimension_numbers=(((1,), (1,)), ((), ())),
                preferred_element_type=jnp.float32)                    # (S, S)
            s = s + (slopes_ref[h] * rel + causal)

            # float32 softmax along the key axis (matches the reference).
            s = s - jnp.max(s, axis=-1, keepdims=True)
            p = jnp.exp(s)
            p = p * pl.reciprocal(jnp.sum(p, axis=-1, keepdims=True),
                                  approx=True)

            heads.append(jnp.dot(p, v_h,
                                 preferred_element_type=jnp.float32))  # (S, hd)

        # Merge the 4 head outputs along lanes (width 32 fits one vreg).
        per_batch.append(jnp.concatenate(heads, axis=1))               # (S, D)

    # Deferred output projection: ONE (B*S, D) @ (D, D) matmul instead of
    # 8 tiny per-head matmuls.
    attn = jnp.concatenate(per_batch, axis=0)                          # (B*S, D)
    out = jnp.dot(attn, wo_ref[...], preferred_element_type=jnp.float32)
    o_ref[...] = out.astype(o_ref.dtype)


# -------------------------------- wrapper ---------------------------------------
def prepare_attention_params(wq, wk, wv, wo):
    """One-time parameter fusion (NOT on the per-call hot path).

    wq/wk/wv/wo follow the torch nn.Linear convention (out, in).
    Returns (wqkv, wo_t) with the softmax scale folded into the Wq columns.
    """
    inv_sqrt_hd = 1.0 / math.sqrt(HEAD_DIM)
    wqkv = jnp.concatenate([wq.T * inv_sqrt_hd, wk.T, wv.T], axis=1)   # (D, 3D)
    return wqkv, wo.T                                                  # (D, D)


@jax.jit
def alibi_attention(x, wqkv, wo_t, slopes):
    """Hot path: x (B, S, D) f32, pre-fused weights, slopes (H,) f32."""
    B, S, D = x.shape
    xf = x.reshape(B * S, D)                                           # free reshape

    vmem = pltpu.MemorySpace.VMEM
    smem = pltpu.MemorySpace.SMEM
    out2d = pl.pallas_call(
        attention_kernel,
        out_shape=jax.ShapeDtypeStruct((B * S, D), x.dtype),
        in_specs=[
            pl.BlockSpec(memory_space=vmem),   # flattened activations
            pl.BlockSpec(memory_space=vmem),   # fused Wqkv^T (q pre-scaled)
            pl.BlockSpec(memory_space=vmem),   # Wo^T
            pl.BlockSpec(memory_space=smem),   # per-head ALiBi slopes
        ],
        out_specs=pl.BlockSpec(memory_space=vmem),
    )(xf, wqkv, wo_t, slopes)
    return out2d.reshape(B, S, D)


# ----------------------------- reference (plain JAX) ----------------------------
def alibi_attention_ref(x, wq, wk, wv, wo, mask):
    B, S, D = x.shape
    H, hd = N_HEADS, HEAD_DIM
    q = (x @ wq.T).reshape(B, S, H, hd).transpose(0, 2, 1, 3)
    k = (x @ wk.T).reshape(B, S, H, hd).transpose(0, 2, 1, 3)
    v = (x @ wv.T).reshape(B, S, H, hd).transpose(0, 2, 1, 3)
    scores = jnp.einsum("bhqd,bhkd->bhqk", q, k) / math.sqrt(hd)
    scores = scores + mask[None]  # broadcast over batch
    p = jax.nn.softmax(scores.astype(jnp.float32), axis=-1).astype(q.dtype)
    out = jnp.einsum("bhqk,bhkd->bhqd", p, v)
    out = out.transpose(0, 2, 1, 3).reshape(B, S, D)
    return out @ wo.T


# ------------------------------ mask construction -------------------------------
def build_alibi_slopes(n_heads):
    # Standard ALiBi slopes: 2^(-8*(h+1)/n_heads)
    return np.array([2.0 ** (-8.0 * (h + 1) / n_heads) for h in range(n_heads)],
                    dtype=np.float32)


def build_alibi_causal_mask(slopes, seq):
    qpos = np.arange(seq)[:, None]
    kpos = np.arange(seq)[None, :]
    rel = (kpos - qpos).astype(np.float32)          # (S, S), <=0 for visible keys
    bias = slopes[:, None, None] * rel[None]        # (H, S, S)
    causal = np.where(kpos <= qpos, 0.0, NEG_INF).astype(np.float32)
    return jnp.asarray(bias + causal[None])         # (H, S, S)


# ----------------------------------- main ----------------------------------------
if __name__ == "__main__":
    key = jax.random.PRNGKey(0)
    kx, kq, kk, kv, ko = jax.random.split(key, 5)

    x = jax.random.normal(kx, (BATCH, SEQ, DIM), dtype=jnp.float32)

    # Deterministic synthetic weights (torch nn.Linear convention: (out, in)).
    std = 0.02
    wq = jax.random.normal(kq, (DIM, DIM), dtype=jnp.float32) * std
    wk = jax.random.normal(kk, (DIM, DIM), dtype=jnp.float32) * std
    wv = jax.random.normal(kv, (DIM, DIM), dtype=jnp.float32) * std
    wo = jax.random.normal(ko, (DIM, DIM), dtype=jnp.float32) * std

    slopes_np = build_alibi_slopes(N_HEADS)
    slopes = jnp.asarray(slopes_np)                      # kernel input (SMEM)
    mask = build_alibi_causal_mask(slopes_np, SEQ)       # reference-only mask

    # One-time parameter fusion (off the hot path).
    wqkv, wo_t = prepare_attention_params(wq, wk, wv, wo)

    out = alibi_attention(x, wqkv, wo_t, slopes)
    out = jax.block_until_ready(out)

    ref = alibi_attention_ref(x, wq, wk, wv, wo, mask)
    # Tolerance slightly relaxed vs an exact-reciprocal version because the
    # softmax denominator uses the EUP approximate reciprocal.
    np.testing.assert_allclose(np.asarray(out), np.asarray(ref),
                               rtol=2e-3, atol=2e-5)

    print("KERNEL_OK")
</pallas_src>

<mosaic_0001>
module attributes {stable_mosaic.version = 11 : i64} {
  func.func @attention_kernel(%arg0: memref<16x32xf32, #tpu.memory_space<vmem>>, %arg1: memref<32x96xf32, #tpu.memory_space<vmem>>, %arg2: memref<32x32xf32, #tpu.memory_space<vmem>>, %arg3: memref<4xf32, #tpu.memory_space<smem>>, %arg4: memref<16x32xf32, #tpu.memory_space<vmem>>) attributes {dimension_semantics = [], scalar_prefetch = 0 : i64, scratch_operands = 0 : i64, tpu.core_type = #tpu.core_type<tc>} {
    %c0 = arith.constant 0 : index
    %c0_0 = arith.constant 0 : index
    %0 = vector.load %arg0[%c0, %c0_0] : memref<16x32xf32, #tpu.memory_space<vmem>>, vector<16x32xf32>
    %c0_1 = arith.constant 0 : index
    %c0_2 = arith.constant 0 : index
    %1 = vector.load %arg1[%c0_1, %c0_2] : memref<32x96xf32, #tpu.memory_space<vmem>>, vector<32x96xf32>
    %cst = arith.constant dense<0.000000e+00> : vector<16x96xf32>
    %2 = tpu.matmul %0, %1, %cst {dimension_numbers = #tpu.dot_dimension_numbers<[1], [0], [0], [1], [0, 0, 1, 1], [], []>} : vector<16x32xf32>, vector<32x96xf32>, vector<16x96xf32> -> vector<16x96xf32>
    %3 = tpu.iota {dimensions = array<i32: 0>} : vector<8x8xi32>
    %4 = tpu.iota {dimensions = array<i32: 1>} : vector<8x8xi32>
    %5 = arith.subi %4, %3 : vector<8x8xi32>
    %6 = arith.sitofp %5 : vector<8x8xi32> to vector<8x8xf32>
    %7 = arith.cmpi sle, %4, %3 : vector<8x8xi32>
    %cst_3 = arith.constant 0.000000e+00 : f32
    %cst_4 = arith.constant -1.000000e+09 : f32
    %8 = vector.broadcast %cst_3 : f32 to vector<8x8xf32>
    %9 = vector.broadcast %cst_4 : f32 to vector<8x8xf32>
    %10 = arith.select %7, %8, %9 : vector<8x8xi1>, vector<8x8xf32>
    %11 = vector.extract_strided_slice %2 {offsets = [0, 0], sizes = [8, 8], strides = [1, 1]} : vector<16x96xf32> to vector<8x8xf32>
    %12 = vector.extract_strided_slice %2 {offsets = [0, 32], sizes = [8, 8], strides = [1, 1]} : vector<16x96xf32> to vector<8x8xf32>
    %13 = vector.extract_strided_slice %2 {offsets = [0, 64], sizes = [8, 8], strides = [1, 1]} : vector<16x96xf32> to vector<8x8xf32>
    %cst_5 = arith.constant dense<0.000000e+00> : vector<8x8xf32>
    %14 = tpu.matmul %11, %12, %cst_5 {dimension_numbers = #tpu.dot_dimension_numbers<[1], [1], [0], [0], [0, 0, 1, 0], [], []>} : vector<8x8xf32>, vector<8x8xf32>, vector<8x8xf32> -> vector<8x8xf32>
    %c0_6 = arith.constant 0 : index
    %15 = memref.load %arg3[%c0_6] : memref<4xf32, #tpu.memory_space<smem>>
    %16 = vector.broadcast %15 : f32 to vector<8x8xf32>
    %17 = arith.mulf %16, %6 : vector<8x8xf32>
    %18 = arith.addf %17, %10 : vector<8x8xf32>
    %19 = arith.addf %14, %18 : vector<8x8xf32>
    %cst_7 = arith.constant dense<0xFF800000> : vector<8xf32>
    %20 = vector.multi_reduction <maximumf>, %19, %cst_7 [1] : vector<8x8xf32> to vector<8xf32>
    %21 = vector.shape_cast %20 : vector<8xf32> to vector<8x1xf32>
    %22 = vector.broadcast %21 : vector<8x1xf32> to vector<8x8xf32>
    %23 = arith.subf %19, %22 : vector<8x8xf32>
    %24 = math.exp %23 : vector<8x8xf32>
    %cst_8 = arith.constant dense<0.000000e+00> : vector<8xf32>
    %25 = vector.multi_reduction <add>, %24, %cst_8 [1] : vector<8x8xf32> to vector<8xf32>
    %26 = vector.shape_cast %25 : vector<8xf32> to vector<8x1xf32>
    %27 = tpu.reciprocal %26 {approx = true} : vector<8x1xf32> -> vector<8x1xf32>
    %28 = vector.broadcast %27 : vector<8x1xf32> to vector<8x8xf32>
    %29 = arith.mulf %24, %28 : vector<8x8xf32>
    %cst_9 = arith.constant dense<0.000000e+00> : vector<8x8xf32>
    %30 = tpu.matmul %29, %13, %cst_9 {dimension_numbers = #tpu.dot_dimension_numbers<[1], [0], [0], [1], [0, 0, 1, 1], [], []>} : vector<8x8xf32>, vector<8x8xf32>, vector<8x8xf32> -> vector<8x8xf32>
    %31 = vector.extract_strided_slice %2 {offsets = [0, 8], sizes = [8, 8], strides = [1, 1]} : vector<16x96xf32> to vector<8x8xf32>
    %32 = vector.extract_strided_slice %2 {offsets = [0, 40], sizes = [8, 8], strides = [1, 1]} : vector<16x96xf32> to vector<8x8xf32>
    %33 = vector.extract_strided_slice %2 {offsets = [0, 72], sizes = [8, 8], strides = [1, 1]} : vector<16x96xf32> to vector<8x8xf32>
    %cst_10 = arith.constant dense<0.000000e+00> : vector<8x8xf32>
    %34 = tpu.matmul %31, %32, %cst_10 {dimension_numbers = #tpu.dot_dimension_numbers<[1], [1], [0], [0], [0, 0, 1, 0], [], []>} : vector<8x8xf32>, vector<8x8xf32>, vector<8x8xf32> -> vector<8x8xf32>
    %c1 = arith.constant 1 : index
    %35 = memref.load %arg3[%c1] : memref<4xf32, #tpu.memory_space<smem>>
    %36 = vector.broadcast %35 : f32 to vector<8x8xf32>
    %37 = arith.mulf %36, %6 : vector<8x8xf32>
    %38 = arith.addf %37, %10 : vector<8x8xf32>
    %39 = arith.addf %34, %38 : vector<8x8xf32>
    %cst_11 = arith.constant dense<0xFF800000> : vector<8xf32>
    %40 = vector.multi_reduction <maximumf>, %39, %cst_11 [1] : vector<8x8xf32> to vector<8xf32>
    %41 = vector.shape_cast %40 : vector<8xf32> to vector<8x1xf32>
    %42 = vector.broadcast %41 : vector<8x1xf32> to vector<8x8xf32>
    %43 = arith.subf %39, %42 : vector<8x8xf32>
    %44 = math.exp %43 : vector<8x8xf32>
    %cst_12 = arith.constant dense<0.000000e+00> : vector<8xf32>
    %45 = vector.multi_reduction <add>, %44, %cst_12 [1] : vector<8x8xf32> to vector<8xf32>
    %46 = vector.shape_cast %45 : vector<8xf32> to vector<8x1xf32>
    %47 = tpu.reciprocal %46 {approx = true} : vector<8x1xf32> -> vector<8x1xf32>
    %48 = vector.broadcast %47 : vector<8x1xf32> to vector<8x8xf32>
    %49 = arith.mulf %44, %48 : vector<8x8xf32>
    %cst_13 = arith.constant dense<0.000000e+00> : vector<8x8xf32>
    %50 = tpu.matmul %49, %33, %cst_13 {dimension_numbers = #tpu.dot_dimension_numbers<[1], [0], [0], [1], [0, 0, 1, 1], [], []>} : vector<8x8xf32>, vector<8x8xf32>, vector<8x8xf32> -> vector<8x8xf32>
    %51 = vector.extract_strided_slice %2 {offsets = [0, 16], sizes = [8, 8], strides = [1, 1]} : vector<16x96xf32> to vector<8x8xf32>
    %52 = vector.extract_strided_slice %2 {offsets = [0, 48], sizes = [8, 8], strides = [1, 1]} : vector<16x96xf32> to vector<8x8xf32>
    %53 = vector.extract_strided_slice %2 {offsets = [0, 80], sizes = [8, 8], strides = [1, 1]} : vector<16x96xf32> to vector<8x8xf32>
    %cst_14 = arith.constant dense<0.000000e+00> : vector<8x8xf32>
    %54 = tpu.matmul %51, %52, %cst_14 {dimension_numbers = #tpu.dot_dimension_numbers<[1], [1], [0], [0], [0, 0, 1, 0], [], []>} : vector<8x8xf32>, vector<8x8xf32>, vector<8x8xf32> -> vector<8x8xf32>
    %c2 = arith.constant 2 : index
    %55 = memref.load %arg3[%c2] : memref<4xf32, #tpu.memory_space<smem>>
    %56 = vector.broadcast %55 : f32 to vector<8x8xf32>
    %57 = arith.mulf %56, %6 : vector<8x8xf32>
    %58 = arith.addf %57, %10 : vector<8x8xf32>
    %59 = arith.addf %54, %58 : vector<8x8xf32>
    %cst_15 = arith.constant dense<0xFF800000> : vector<8xf32>
    %60 = vector.multi_reduction <maximumf>, %59, %cst_15 [1] : vector<8x8xf32> to vector<8xf32>
    %61 = vector.shape_cast %60 : vector<8xf32> to vector<8x1xf32>
    %62 = vector.broadcast %61 : vector<8x1xf32> to vector<8x8xf32>
    %63 = arith.subf %59, %62 : vector<8x8xf32>
    %64 = math.exp %63 : vector<8x8xf32>
    %cst_16 = arith.constant dense<0.000000e+00> : vector<8xf32>
    %65 = vector.multi_reduction <add>, %64, %cst_16 [1] : vector<8x8xf32> to vector<8xf32>
    %66 = vector.shape_cast %65 : vector<8xf32> to vector<8x1xf32>
    %67 = tpu.reciprocal %66 {approx = true} : vector<8x1xf32> -> vector<8x1xf32>
    %68 = vector.broadcast %67 : vector<8x1xf32> to vector<8x8xf32>
    %69 = arith.mulf %64, %68 : vector<8x8xf32>
    %cst_17 = arith.constant dense<0.000000e+00> : vector<8x8xf32>
    %70 = tpu.matmul %69, %53, %cst_17 {dimension_numbers = #tpu.dot_dimension_numbers<[1], [0], [0], [1], [0, 0, 1, 1], [], []>} : vector<8x8xf32>, vector<8x8xf32>, vector<8x8xf32> -> vector<8x8xf32>
    %71 = vector.extract_strided_slice %2 {offsets = [0, 24], sizes = [8, 8], strides = [1, 1]} : vector<16x96xf32> to vector<8x8xf32>
    %72 = vector.extract_strided_slice %2 {offsets = [0, 56], sizes = [8, 8], strides = [1, 1]} : vector<16x96xf32> to vector<8x8xf32>
    %73 = vector.extract_strided_slice %2 {offsets = [0, 88], sizes = [8, 8], strides = [1, 1]} : vector<16x96xf32> to vector<8x8xf32>
    %cst_18 = arith.constant dense<0.000000e+00> : vector<8x8xf32>
    %74 = tpu.matmul %71, %72, %cst_18 {dimension_numbers = #tpu.dot_dimension_numbers<[1], [1], [0], [0], [0, 0, 1, 0], [], []>} : vector<8x8xf32>, vector<8x8xf32>, vector<8x8xf32> -> vector<8x8xf32>
    %c3 = arith.constant 3 : index
    %75 = memref.load %arg3[%c3] : memref<4xf32, #tpu.memory_space<smem>>
    %76 = vector.broadcast %75 : f32 to vector<8x8xf32>
    %77 = arith.mulf %76, %6 : vector<8x8xf32>
    %78 = arith.addf %77, %10 : vector<8x8xf32>
    %79 = arith.addf %74, %78 : vector<8x8xf32>
    %cst_19 = arith.constant dense<0xFF800000> : vector<8xf32>
    %80 = vector.multi_reduction <maximumf>, %79, %cst_19 [1] : vector<8x8xf32> to vector<8xf32>
    %81 = vector.shape_cast %80 : vector<8xf32> to vector<8x1xf32>
    %82 = vector.broadcast %81 : vector<8x1xf32> to vector<8x8xf32>
    %83 = arith.subf %79, %82 : vector<8x8xf32>
    %84 = math.exp %83 : vector<8x8xf32>
    %cst_20 = arith.constant dense<0.000000e+00> : vector<8xf32>
    %85 = vector.multi_reduction <add>, %84, %cst_20 [1] : vector<8x8xf32> to vector<8xf32>
    %86 = vector.shape_cast %85 : vector<8xf32> to vector<8x1xf32>
    %87 = tpu.reciprocal %86 {approx = true} : vector<8x1xf32> -> vector<8x1xf32>
    %88 = vector.broadcast %87 : vector<8x1xf32> to vector<8x8xf32>
    %89 = arith.mulf %84, %88 : vector<8x8xf32>
    %cst_21 = arith.constant dense<0.000000e+00> : vector<8x8xf32>
    %90 = tpu.matmul %89, %73, %cst_21 {dimension_numbers = #tpu.dot_dimension_numbers<[1], [0], [0], [1], [0, 0, 1, 1], [], []>} : vector<8x8xf32>, vector<8x8xf32>, vector<8x8xf32> -> vector<8x8xf32>
    %91 = tpu.concatenate %30, %50, %70, %90 in 1 : vector<8x8xf32>, vector<8x8xf32>, vector<8x8xf32>, vector<8x8xf32> -> vector<8x32xf32>
    %92 = vector.extract_strided_slice %2 {offsets = [8, 0], sizes = [8, 8], strides = [1, 1]} : vector<16x96xf32> to vector<8x8xf32>
    %93 = vector.extract_strided_slice %2 {offsets = [8, 32], sizes = [8, 8], strides = [1, 1]} : vector<16x96xf32> to vector<8x8xf32>
    %94 = vector.extract_strided_slice %2 {offsets = [8, 64], sizes = [8, 8], strides = [1, 1]} : vector<16x96xf32> to vector<8x8xf32>
    %cst_22 = arith.constant dense<0.000000e+00> : vector<8x8xf32>
    %95 = tpu.matmul %92, %93, %cst_22 {dimension_numbers = #tpu.dot_dimension_numbers<[1], [1], [0], [0], [0, 0, 1, 0], [], []>} : vector<8x8xf32>, vector<8x8xf32>, vector<8x8xf32> -> vector<8x8xf32>
    %c0_23 = arith.constant 0 : index
    %96 = memref.load %arg3[%c0_23] : memref<4xf32, #tpu.memory_space<smem>>
    %97 = vector.broadcast %96 : f32 to vector<8x8xf32>
    %98 = arith.mulf %97, %6 : vector<8x8xf32>
    %99 = arith.addf %98, %10 : vector<8x8xf32>
    %100 = arith.addf %95, %99 : vector<8x8xf32>
    %cst_24 = arith.constant dense<0xFF800000> : vector<8xf32>
    %101 = vector.multi_reduction <maximumf>, %100, %cst_24 [1] : vector<8x8xf32> to vector<8xf32>
    %102 = vector.shape_cast %101 : vector<8xf32> to vector<8x1xf32>
    %103 = vector.broadcast %102 : vector<8x1xf32> to vector<8x8xf32>
    %104 = arith.subf %100, %103 : vector<8x8xf32>
    %105 = math.exp %104 : vector<8x8xf32>
    %cst_25 = arith.constant dense<0.000000e+00> : vector<8xf32>
    %106 = vector.multi_reduction <add>, %105, %cst_25 [1] : vector<8x8xf32> to vector<8xf32>
    %107 = vector.shape_cast %106 : vector<8xf32> to vector<8x1xf32>
    %108 = tpu.reciprocal %107 {approx = true} : vector<8x1xf32> -> vector<8x1xf32>
    %109 = vector.broadcast %108 : vector<8x1xf32> to vector<8x8xf32>
    %110 = arith.mulf %105, %109 : vector<8x8xf32>
    %cst_26 = arith.constant dense<0.000000e+00> : vector<8x8xf32>
    %111 = tpu.matmul %110, %94, %cst_26 {dimension_numbers = #tpu.dot_dimension_numbers<[1], [0], [0], [1], [0, 0, 1, 1], [], []>} : vector<8x8xf32>, vector<8x8xf32>, vector<8x8xf32> -> vector<8x8xf32>
    %112 = vector.extract_strided_slice %2 {offsets = [8, 8], sizes = [8, 8], strides = [1, 1]} : vector<16x96xf32> to vector<8x8xf32>
    %113 = vector.extract_strided_slice %2 {offsets = [8, 40], sizes = [8, 8], strides = [1, 1]} : vector<16x96xf32> to vector<8x8xf32>
    %114 = vector.extract_strided_slice %2 {offsets = [8, 72], sizes = [8, 8], strides = [1, 1]} : vector<16x96xf32> to vector<8x8xf32>
    %cst_27 = arith.constant dense<0.000000e+00> : vector<8x8xf32>
    %115 = tpu.matmul %112, %113, %cst_27 {dimension_numbers = #tpu.dot_dimension_numbers<[1], [1], [0], [0], [0, 0, 1, 0], [], []>} : vector<8x8xf32>, vector<8x8xf32>, vector<8x8xf32> -> vector<8x8xf32>
    %c1_28 = arith.constant 1 : index
    %116 = memref.load %arg3[%c1_28] : memref<4xf32, #tpu.memory_space<smem>>
    %117 = vector.broadcast %116 : f32 to vector<8x8xf32>
    %118 = arith.mulf %117, %6 : vector<8x8xf32>
    %119 = arith.addf %118, %10 : vector<8x8xf32>
    %120 = arith.addf %115, %119 : vector<8x8xf32>
    %cst_29 = arith.constant dense<0xFF800000> : vector<8xf32>
    %121 = vector.multi_reduction <maximumf>, %120, %cst_29 [1] : vector<8x8xf32> to vector<8xf32>
    %122 = vector.shape_cast %121 : vector<8xf32> to vector<8x1xf32>
    %123 = vector.broadcast %122 : vector<8x1xf32> to vector<8x8xf32>
    %124 = arith.subf %120, %123 : vector<8x8xf32>
    %125 = math.exp %124 : vector<8x8xf32>
    %cst_30 = arith.constant dense<0.000000e+00> : vector<8xf32>
    %126 = vector.multi_reduction <add>, %125, %cst_30 [1] : vector<8x8xf32> to vector<8xf32>
    %127 = vector.shape_cast %126 : vector<8xf32> to vector<8x1xf32>
    %128 = tpu.reciprocal %127 {approx = true} : vector<8x1xf32> -> vector<8x1xf32>
    %129 = vector.broadcast %128 : vector<8x1xf32> to vector<8x8xf32>
    %130 = arith.mulf %125, %129 : vector<8x8xf32>
    %cst_31 = arith.constant dense<0.000000e+00> : vector<8x8xf32>
    %131 = tpu.matmul %130, %114, %cst_31 {dimension_numbers = #tpu.dot_dimension_numbers<[1], [0], [0], [1], [0, 0, 1, 1], [], []>} : vector<8x8xf32>, vector<8x8xf32>, vector<8x8xf32> -> vector<8x8xf32>
    %132 = vector.extract_strided_slice %2 {offsets = [8, 16], sizes = [8, 8], strides = [1, 1]} : vector<16x96xf32> to vector<8x8xf32>
    %133 = vector.extract_strided_slice %2 {offsets = [8, 48], sizes = [8, 8], strides = [1, 1]} : vector<16x96xf32> to vector<8x8xf32>
    %134 = vector.extract_strided_slice %2 {offsets = [8, 80], sizes = [8, 8], strides = [1, 1]} : vector<16x96xf32> to vector<8x8xf32>
    %cst_32 = arith.constant dense<0.000000e+00> : vector<8x8xf32>
    %135 = tpu.matmul %132, %133, %cst_32 {dimension_numbers = #tpu.dot_dimension_numbers<[1], [1], [0], [0], [0, 0, 1, 0], [], []>} : vector<8x8xf32>, vector<8x8xf32>, vector<8x8xf32> -> vector<8x8xf32>
    %c2_33 = arith.constant 2 : index
    %136 = memref.load %arg3[%c2_33] : memref<4xf32, #tpu.memory_space<smem>>
    %137 = vector.broadcast %136 : f32 to vector<8x8xf32>
    %138 = arith.mulf %137, %6 : vector<8x8xf32>
    %139 = arith.addf %138, %10 : vector<8x8xf32>
    %140 = arith.addf %135, %139 : vector<8x8xf32>
    %cst_34 = arith.constant dense<0xFF800000> : vector<8xf32>
    %141 = vector.multi_reduction <maximumf>, %140, %cst_34 [1] : vector<8x8xf32> to vector<8xf32>
    %142 = vector.shape_cast %141 : vector<8xf32> to vector<8x1xf32>
    %143 = vector.broadcast %142 : vector<8x1xf32> to vector<8x8xf32>
    %144 = arith.subf %140, %143 : vector<8x8xf32>
    %145 = math.exp %144 : vector<8x8xf32>
    %cst_35 = arith.constant dense<0.000000e+00> : vector<8xf32>
    %146 = vector.multi_reduction <add>, %145, %cst_35 [1] : vector<8x8xf32> to vector<8xf32>
    %147 = vector.shape_cast %146 : vector<8xf32> to vector<8x1xf32>
    %148 = tpu.reciprocal %147 {approx = true} : vector<8x1xf32> -> vector<8x1xf32>
    %149 = vector.broadcast %148 : vector<8x1xf32> to vector<8x8xf32>
    %150 = arith.mulf %145, %149 : vector<8x8xf32>
    %cst_36 = arith.constant dense<0.000000e+00> : vector<8x8xf32>
    %151 = tpu.matmul %150, %134, %cst_36 {dimension_numbers = #tpu.dot_dimension_numbers<[1], [0], [0], [1], [0, 0, 1, 1], [], []>} : vector<8x8xf32>, vector<8x8xf32>, vector<8x8xf32> -> vector<8x8xf32>
    %152 = vector.extract_strided_slice %2 {offsets = [8, 24], sizes = [8, 8], strides = [1, 1]} : vector<16x96xf32> to vector<8x8xf32>
    %153 = vector.extract_strided_slice %2 {offsets = [8, 56], sizes = [8, 8], strides = [1, 1]} : vector<16x96xf32> to vector<8x8xf32>
    %154 = vector.extract_strided_slice %2 {offsets = [8, 88], sizes = [8, 8], strides = [1, 1]} : vector<16x96xf32> to vector<8x8xf32>
    %cst_37 = arith.constant dense<0.000000e+00> : vector<8x8xf32>
    %155 = tpu.matmul %152, %153, %cst_37 {dimension_numbers = #tpu.dot_dimension_numbers<[1], [1], [0], [0], [0, 0, 1, 0], [], []>} : vector<8x8xf32>, vector<8x8xf32>, vector<8x8xf32> -> vector<8x8xf32>
    %c3_38 = arith.constant 3 : index
    %156 = memref.load %arg3[%c3_38] : memref<4xf32, #tpu.memory_space<smem>>
    %157 = vector.broadcast %156 : f32 to vector<8x8xf32>
    %158 = arith.mulf %157, %6 : vector<8x8xf32>
    %159 = arith.addf %158, %10 : vector<8x8xf32>
    %160 = arith.addf %155, %159 : vector<8x8xf32>
    %cst_39 = arith.constant dense<0xFF800000> : vector<8xf32>
    %161 = vector.multi_reduction <maximumf>, %160, %cst_39 [1] : vector<8x8xf32> to vector<8xf32>
    %162 = vector.shape_cast %161 : vector<8xf32> to vector<8x1xf32>
    %163 = vector.broadcast %162 : vector<8x1xf32> to vector<8x8xf32>
    %164 = arith.subf %160, %163 : vector<8x8xf32>
    %165 = math.exp %164 : vector<8x8xf32>
    %cst_40 = arith.constant dense<0.000000e+00> : vector<8xf32>
    %166 = vector.multi_reduction <add>, %165, %cst_40 [1] : vector<8x8xf32> to vector<8xf32>
    %167 = vector.shape_cast %166 : vector<8xf32> to vector<8x1xf32>
    %168 = tpu.reciprocal %167 {approx = true} : vector<8x1xf32> -> vector<8x1xf32>
    %169 = vector.broadcast %168 : vector<8x1xf32> to vector<8x8xf32>
    %170 = arith.mulf %165, %169 : vector<8x8xf32>
    %cst_41 = arith.constant dense<0.000000e+00> : vector<8x8xf32>
    %171 = tpu.matmul %170, %154, %cst_41 {dimension_numbers = #tpu.dot_dimension_numbers<[1], [0], [0], [1], [0, 0, 1, 1], [], []>} : vector<8x8xf32>, vector<8x8xf32>, vector<8x8xf32> -> vector<8x8xf32>
    %172 = tpu.concatenate %111, %131, %151, %171 in 1 : vector<8x8xf32>, vector<8x8xf32>, vector<8x8xf32>, vector<8x8xf32> -> vector<8x32xf32>
    %173 = tpu.concatenate %91, %172 in 0 : vector<8x32xf32>, vector<8x32xf32> -> vector<16x32xf32>
    %c0_42 = arith.constant 0 : index
    %c0_43 = arith.constant 0 : index
    %174 = vector.load %arg2[%c0_42, %c0_43] : memref<32x32xf32, #tpu.memory_space<vmem>>, vector<32x32xf32>
    %cst_44 = arith.constant dense<0.000000e+00> : vector<16x32xf32>
    %175 = tpu.matmul %173, %174, %cst_44 {dimension_numbers = #tpu.dot_dimension_numbers<[1], [0], [0], [1], [0, 0, 1, 1], [], []>} : vector<16x32xf32>, vector<32x32xf32>, vector<16x32xf32> -> vector<16x32xf32>
    %c0_45 = arith.constant 0 : index
    %c0_46 = arith.constant 0 : index
    %176 = vector.load %arg4[%c0_45, %c0_46] : memref<16x32xf32, #tpu.memory_space<vmem>>, vector<16x32xf32>
    tpu.vector_store %arg4[%c0_45, %c0_46], %175 {strides = array<i32>} : memref<16x32xf32, #tpu.memory_space<vmem>>, vector<16x32xf32>,
    return
  }
}

</mosaic_0001>

<bundles_post_ra>
// kernel: alibi_attention.1
= control target key start
LH: loop header
LB: loop body
LE: loop exit
PB: predicated region body
PF: predicated region fallthrough
CT: control target
= control target key end

     0   :  { %9 = vsyncpa [#allocation3], 0  ;;  %s1153_s0 = inlined_call_operand.hbm [shape: f32[16,32], index: 0, kind: input, shape index: {}]   ;;  %s1154_s1 = inlined_call_operand.hbm [shape: f32[32,96], index: 1, kind: input, shape index: {}]   ;;  %s1155_s2 = inlined_call_operand.hbm [shape: f32[32,32], index: 2, kind: input, shape index: {}]   ;;  %s1156_s3 = inlined_call_operand.vmem [shape: f32[4], index: 3, kind: input, shape index: {}]   ;;  %s1157_s4 = inlined_call_operand.hbm [shape: f32[16,32], index: 4, kind: output, shape index: {}]  }
   0x1   :  { %10 = vsyncpa [#allocation7], 0 }
   0x2   :  { %11 = vsyncpa [#allocation5], 0 }
   0x3   :  { %12 = vsyncpa [#allocation4], 0  ;;  %s30_s17 = sshll.u32 %s1154_s1, 4  ;;  %s945_s18 = smov [#allocation6]   ;;  %s31_s17 = int_to_ptr.hbm [resolvable:$true] %s30_s17 }
   0x4   :  { %s32_s19 = sshll.u32 %s945_s18, 4  ;;  %s17_s22 = sshll.u32 %s1153_s0, 4  ;;  %s33_s19 = int_to_ptr.vmem [resolvable:$true] %s32_s19  ;;  %s18_s22 = int_to_ptr.hbm [resolvable:$true] %s17_s22 }
   0x5   :  { %s946_s23 = smov 128   ;;  %s947_s24 = smov 8  }
   0x6   :  { %38 = dma.hbm_to_vmem [thread:$0]  %s31_s17, 512, %s33_s19, [#allocation7], %s946_s23, %s946_s23, %s947_s24  }
   0x7   :  { %s948_s25 = smov [#allocation2]   ;;  %s43_s1 = sshll.u32 %s1155_s2, 4  ;;  %s44_s1 = int_to_ptr.hbm [resolvable:$true] %s43_s1 }
   0x8   :  { %s19_s26 = sshll.u32 %s948_s25, 4  ;;  %s57_s30 = sshll.u32 %s1156_s3, 4  ;;  %s20_s26 = int_to_ptr.vmem [resolvable:$true] %s19_s26  ;;  %s58_s30 = int_to_ptr.vmem [resolvable:$true] %s57_s30 }
   0x9   :  { %25 = dma.hbm_to_vmem [thread:$0]  %s18_s22, 256, %s20_s26, [#allocation3], %s946_s23, %s946_s23, %s947_s24  }
   0xa   :  { %s949_s5 = smov [#allocation8]   ;;  %s950_s7 = smov [#allocation9]  }
   0xb   :  { %s45_s6 = sshll.u32 %s949_s5, 4  ;;  %s46_s6 = int_to_ptr.vmem [resolvable:$true] %s45_s6 }
   0xc   :  { %51 = dma.hbm_to_vmem [thread:$0]  %s44_s1, 512, %s46_s6, [#allocation7], %s946_s23, %s946_s23, %s947_s24  }
   0xd   :  { %60 = dma.vmem_to_smem %s58_s30, 16, %s950_s7, [#allocation5]  }
   0xe   :  { %937 = dma.done.wait [#allocation3], 256  }
   0xf   :  { %938 = vsyncadd [#allocation3], 4294967040 }
  0x10   :  { %939 = dma.done.wait [#allocation7], 1024  }
  0x11   :  { %940 = vsyncadd [#allocation7], 4294966272 }
  0x12   :  { %941 = dma.done.wait [#allocation5], 16  }
  0x13   :  { %942 = vsyncadd [#allocation5], 4294967280 }
  0x14   :  { %77 = sfence }
  0x15   :  { %v83_v0 = vld [vmem:[#allocation6 + $0x18] sm:$0xff]  ;;  %v82_v1 = vld [vmem:[#allocation6 + $0x10] sm:$0xff]  ;;  %v81_v2 = vld [vmem:[#allocation6 + $0x8] sm:$0xff]  ;;  %vm84_vm0 = vcmask 261120   ;;  %s951_s2 = smov 112   ;;  %s952_s3 = smov 120   ;;  %v114_v12 = vlaneseq }
  0x16   :  { %103 = vmatpush.msra.mxu0 %v83_v0  ;;  %v80_v3 = vld [vmem:[#allocation6] sm:$0xff]  ;;  %v78_v4 = vld [vmem:[#allocation2] sm:$0xff]  ;;  %s953_s8 = smov 96   ;;  %s954_s9 = smov 80   ;;  %v79_v6 = vld [vmem:[#allocation2 + $0x8] sm:$0xff]  ;;  %vm129_vm1 = vcmask 64512  }
  0x17   :  { %s955_s10 = smov 88   ;;  %s956_s11 = smov 72   ;;  %v115_v13 = vshrl.u32 %v114_v12, 7  ;;  %v117_v14 = vand.u32 127, %v114_v12  ;;  %v957_v19 = vmov -1e+09  }
  0x18   :  { %104 = vmatpush.msra.mxu0 %v82_v1  ;;  %s122_s12 = sld [smem:[#allocation9]]  ;;  %s958_s15 = smov 56   ;;  %vm411_vm3 = vcmask 130048   ;;  %vm413_vm4 = vcmask 195584  }
  0x19   :  { %v118_v15 = vsub.s32 %v117_v14, %v115_v13  ;;  %s750_s13 = sld [smem:[#allocation9 + $0x1]]  ;;  %vm120_vm2 = vcmp.le.s32.totalorder %v117_v14, %v115_v13  ;;  %s959_s16 = smov 64  }
  0x1a   :  { %105 = vmatpush.msra.mxu0 %v81_v2  ;;  %s754_s14 = sld [smem:[#allocation9 + $0x2]]  ;;  %v1038_v20 = vsel %vm120_vm2, 0.0, %v957_v19  ;;  %s960_s17 = smov 48  }
  0x1b   :  { %v1035_v16 = vcvt.s32.f32 %v118_v15  ;;  %s961_s18 = smov 104   ;;  %s758_s19 = sld [smem:[#allocation9 + $0x3]] }
  0x1c   :  { %106 = vmatpush.msra.mxu0 %v80_v3  ;;  %s962_s20 = smov 40   ;;  %s963_s21 = smov 16  }
  0x1d   :  { %745 = vmatmul.msk.f32.vlgmr.msra.gmra.mxu0 %vm84_vm0, %v78_v4  ;;  %s964_s22 = smov 24   ;;  %s965_s25 = smov [#allocation10]  }
  0x1e   :  { %v123_v17 = vstv %s122_s12  ;;  %s728_s26 = sshll.u32 %s965_s25, 4  ;;  %s730_s1 = sshll.u32 %s1157_s4, 4  ;;  %s729_s26 = int_to_ptr.vmem [resolvable:$true] %s728_s26  ;;  %s731_s1 = int_to_ptr.hbm [resolvable:$true] %s730_s1 }
  0x1f   :  { %v124_v18 = vmul.f32 %v123_v17, %v1035_v16  ;;  %v192_v23 = vstv %s750_s13 }
  0x20   :  { %v261_v24 = vstv %s754_s14  ;;  %v193_v27 = vmul.f32 %v192_v23, %v1035_v16 }
  0x21   :  { %v1041_v21 = vadd.f32 %v124_v18, %v1038_v20  ;;  %v262_v28 = vmul.f32 %v261_v24, %v1035_v16  ;;  %v330_v12 = vstv %s758_s19 }
  0x22   :  { %v1050_v30 = vadd.f32 %v193_v27, %v1038_v20  ;;  %v331_v15 = vmul.f32 %v330_v12, %v1035_v16 }
  0x23   :  { %v1053_v31 = vadd.f32 %v262_v28, %v1038_v20 }
  0x24   :  { %v332_v17 = vadd.f32 %v331_v15, %v1038_v20 }
  0x25   :  { %746 = vmatmul.msk.f32.gmra.mxu0 %vm84_vm0, %v79_v6 }
  0x9a   :  { %v1013_v5 = vpop.f32.mrf.mxu0 }
  0x9b   :  { %264 = vrot.lane.b32.xlu2 %v1013_v5, %s951_s2  ;;  %195 = vrot.lane.b32.xlu1 %v1013_v5, %s952_s3 }
  0x9c   :  { %127 = vrot.lane.b32.xlu0 %v1013_v5, %s953_s8 }
  0xa2   :  { %v1043_v22 = vpop.f32.mrf.mxu0 }
  0xa3   :  { %266 = vrot.lane.b32.xlu1 %v1013_v5, %s954_s9 }
  0xa4   :  { %197 = vrot.lane.b32.xlu0 %v1013_v5, %s955_s10 }
  0xab   :  { %335 = vrot.lane.b32.xlu1 %v1013_v5, %s956_s11 }
  0xf5   :  { %v265_v11 = vpop.permute.xlu2 %264 }
 0x10d   :  { %v196_v7 = vpop.permute.xlu1 %195 }
 0x10e   :  { %v128_v8 = vpop.permute.xlu0 %127 }
 0x10f   :  { %747 = vmatpush.xpose.msk.msra.mxu1 %vm129_vm1, %v128_v8 }
 0x112   :  { %748 = vmatmul.msk.f32.vlgmr.msra.gmra.mxu1 %vm129_vm1, %v1013_v5 }
 0x115   :  { %v267_v9 = vpop.permute.xlu1 %266 }
 0x116   :  { %v198_v10 = vpop.permute.xlu0 %197  ;;  %755 = vmatpush.xpose.msk.msrb.mxu1 %vm129_vm1, %v267_v9 }
 0x117   :  { %751 = vmatpush.xpose.msk.msrb.mxu0 %vm129_vm1, %v198_v10 }
 0x11a   :  { %752 = vmatmul.msk.f32.vlgmr.msrb.gmra.mxu0 %vm129_vm1, %v196_v7  ;;  %756 = vmatmul.msk.f32.vlgmr.msrb.gmra.mxu1 %vm129_vm1, %v265_v11 }
 0x11d   :  { %v336_v38 = vpop.permute.xlu1 %335 }
 0x18f   :  { %v151_v25 = vpop.f32.mrf.mxu1 }
 0x190   :  { %v152_v26 = vadd.f32 %v151_v25, %v1041_v21 }
 0x192   :  { %v154_v29 = vsel %vm129_vm1, %v152_v26, -inf }
 0x193   :  { %155 = vmax.xlane.f32.xlu2 %v154_v29 }
 0x197   :  { %v220_v32 = vpop.f32.mrf.mxu0  ;;  %v289_v33 = vpop.f32.mrf.mxu1 }
 0x198   :  { %v221_v34 = vadd.f32 %v220_v32, %v1050_v30  ;;  %v290_v35 = vadd.f32 %v289_v33, %v1053_v31 }
 0x19a   :  { %v292_v36 = vsel %vm129_vm1, %v290_v35, -inf  ;;  %v223_v37 = vsel %vm129_vm1, %v221_v34, -inf }
 0x19b   :  { %293 = vmax.xlane.f32.xlu1 %v292_v36  ;;  %224 = vmax.xlane.f32.xlu0 %v223_v37 }
 0x1ab   :  { %234 = vrot.lane.b32.xlu2 %v1013_v5, %s958_s15 }
 0x1af   :  { %165 = vrot.lane.b32.xlu0 %v1013_v5, %s959_s16 }
 0x1b3   :  { %416 = vrot.lane.b32.xlu2 %v1043_v22, %s953_s8 }
 0x1b4   :  { %481 = vrot.lane.b32.xlu1 %v1043_v22, %s955_s10 }
 0x1b7   :  { %303 = vrot.lane.b32.xlu0 %v1013_v5, %s960_s17 }
 0x1bb   :  { %546 = vrot.lane.b32.xlu2 %v1043_v22, %s954_s9 }
 0x1bf   :  { %333 = vrot.lane.b32.xlu0 %v1013_v5, %s961_s18 }
 0x1c7   :  { %479 = vrot.lane.b32.xlu0 %v1043_v22, %s952_s3 }
 0x1cf   :  { %544 = vrot.lane.b32.xlu0 %v1043_v22, %s951_s2 }
 0x206   :  { %v156_v39 = vpop.xlane.xlu2 %155 }
 0x207   :  { %v157_v40 = vsub.f32 %v152_v26, %v156_v39 }
 0x209   :  { %v158_v41 = vmul.f32 1.442695, %v157_v40 }
 0x20b   :  { %797 = vpow2.f32 %v158_v41 }
 0x20e   :  { %v294_v42 = vpop.xlane.xlu1 %293  ;;  %v225_v44 = vpop.xlane.xlu0 %224 }
 0x20f   :  { %v295_v43 = vsub.f32 %v290_v35, %v294_v42  ;;  %v226_v45 = vsub.f32 %v221_v34, %v225_v44  ;;  %v235_v54 = vpop.permute.xlu2 %234 }
 0x211   :  { %v798_v46 = vpop.eup %797  ;;  %v296_v47 = vmul.f32 1.442695, %v295_v43  ;;  %v227_v48 = vmul.f32 1.442695, %v226_v45 }
 0x212   :  { %v160_v49 = vsel %vm129_vm1, %v798_v46, 0.0 }
 0x213   :  { %799 = vpow2.f32 %v296_v47  ;;  %161 = vadd.xlane.f32.xlu2 %v160_v49 }
 0x214   :  { %801 = vpow2.f32 %v227_v48 }
 0x217   :  { %v417_v57 = vpop.permute.xlu2 %416 }
 0x219   :  { %v800_v50 = vpop.eup %799 }
 0x21a   :  { %v802_v51 = vpop.eup %801  ;;  %v298_v52 = vsel %vm129_vm1, %v800_v50, 0.0 }
 0x21b   :  { %299 = vadd.xlane.f32.xlu1 %v298_v52  ;;  %v229_v53 = vsel %vm129_vm1, %v802_v51, 0.0 }
 0x21c   :  { %230 = vadd.xlane.f32.xlu2 %v229_v53 }
 0x21f   :  { %v547_v58 = vpop.permute.xlu2 %546 }
 0x221   :  { %v166_v55 = vpop.permute.xlu0 %165 }
 0x222   :  { %186 = vmatpush.msra.mxu2 %v166_v55 }
 0x224   :  { %255 = vmatpush.msrb.mxu2 %v235_v54 }
 0x226   :  { %v482_v59 = vpop.permute.xlu1 %481 }
 0x229   :  { %v304_v56 = vpop.permute.xlu0 %303 }
 0x22a   :  { %324 = vmatpush.msra.mxu3 %v304_v56 }
 0x22c   :  { %762 = vmatpush.xpose.msk.msrb.mxu3 %vm129_vm1, %v417_v57 }
 0x231   :  { %v334_v1 = vpop.permute.xlu0 %333 }
 0x234   :  { %609 = vrot.lane.b32.xlu2 %v1043_v22, %s961_s18  ;;  %611 = vrot.lane.b32.xlu1 %v1043_v22, %s956_s11 }
 0x239   :  { %v480_v7 = vpop.permute.xlu0 %479 }
 0x241   :  { %v545_v9 = vpop.permute.xlu0 %544 }
 0x286   :  { %v162_v60 = vpop.xlane.xlu2 %161 }
 0x287   :  { %803 = vrcp.f32 %v162_v60 }
 0x28d   :  { %v804_v61 = vpop.eup %803 }
 0x28e   :  { %v300_v62 = vpop.xlane.xlu1 %299  ;;  %v164_v63 = vmul.f32 %v804_v61, %v798_v46 }
 0x28f   :  { %805 = vrcp.f32 %v300_v62  ;;  %v231_v0 = vpop.xlane.xlu2 %230 }
 0x290   :  { %807 = vrcp.f32 %v231_v0  ;;  %749 = vmatmul.msk.f32.vlgmr.msra.gmra.mxu2 %vm129_vm1, %v164_v63 }
 0x291   :  { %759 = vmatpush.xpose.msk.msra.mxu2 %vm129_vm1, %v336_v38 }
 0x295   :  { %v806_v2 = vpop.eup %805 }
 0x296   :  { %v808_v3 = vpop.eup %807  ;;  %v302_v4 = vmul.f32 %v806_v2, %v800_v50 }
 0x297   :  { %v233_v6 = vmul.f32 %v808_v3, %v802_v51  ;;  %v610_v10 = vpop.permute.xlu2 %609 }
 0x298   :  { %757 = vmatmul.msk.f32.vlgmr.msra.gmra.mxu3 %vm129_vm1, %v302_v4 }
 0x299   :  { %753 = vmatmul.msk.f32.vlgmr.msrb.gmra.mxu2 %vm129_vm1, %v233_v6  ;;  %768 = vmatpush.xpose.msk.msra.mxu3 %vm129_vm1, %v547_v58 }
 0x29a   :  { %765 = vmatpush.xpose.msk.msrb.mxu2 %vm129_vm1, %v482_v59 }
 0x2a0   :  { %763 = vmatmul.msk.f32.vlgmr.msrb.gmra.mxu3 %vm129_vm1, %v1043_v22 }
 0x2a1   :  { %760 = vmatmul.msk.f32.vlgmr.msra.gmra.mxu2 %vm129_vm1, %v334_v1 }
 0x2a6   :  { %v612_v8 = vpop.permute.xlu1 %611 }
 0x2a7   :  { %771 = vmatpush.xpose.msk.msra.mxu2 %vm129_vm1, %v612_v8 }
 0x2a8   :  { %769 = vmatmul.msk.f32.vlgmr.msra.gmra.mxu3 %vm129_vm1, %v545_v9 }
 0x2a9   :  { %766 = vmatmul.msk.f32.vlgmr.msrb.gmra.mxu2 %vm129_vm1, %v480_v7 }
 0x2b1   :  { %772 = vmatmul.msk.f32.vlgmr.msra.gmra.mxu2 %vm129_vm1, %v610_v10 }
 0x313   :  { %v1098_v11 = vpop.f32.mrf.mxu2 }
 0x31b   :  { %v1100_v13 = vpop.f32.mrf.mxu3 }
 0x31c   :  { %v1102_v14 = vpop.f32.mrf.mxu2 }
 0x323   :  { %v439_v18 = vpop.f32.mrf.mxu3 }
 0x324   :  { %v358_v19 = vpop.f32.mrf.mxu2  ;;  %v440_v23 = vadd.f32 %v439_v18, %v1041_v21  ;;  %v692_v18 = vld [vmem:[#allocation8 + $0x18] sm:$0xff] }
 0x325   :  { %v359_v24 = vadd.f32 %v358_v19, %v332_v17  ;;  %v691_v19 = vld [vmem:[#allocation8 + $0x10] sm:$0xff]  ;;  %711 = vmatpush.msrb.mxu3 %v692_v18 }
 0x326   :  { %v442_v25 = vsel %vm129_vm1, %v440_v23, -inf }
 0x327   :  { %443 = vmax.xlane.f32.xlu0 %v442_v25  ;;  %v361_v26 = vsel %vm129_vm1, %v359_v24, -inf  ;;  %712 = vmatpush.msrb.mxu3 %v691_v19 }
 0x328   :  { %362 = vmax.xlane.f32.xlu1 %v361_v26  ;;  %v689_v26 = vld [vmem:[#allocation8] sm:$0xff] }
 0x32b   :  { %v569_v27 = vpop.f32.mrf.mxu3 }
 0x32c   :  { %v504_v28 = vpop.f32.mrf.mxu2  ;;  %v570_v29 = vadd.f32 %v569_v27, %v1053_v31 }
 0x32d   :  { %v505_v32 = vadd.f32 %v504_v28, %v1050_v30 }
 0x32e   :  { %v572_v16 = vsel %vm129_vm1, %v570_v29, -inf }
 0x32f   :  { %v507_v20 = vsel %vm129_vm1, %v505_v32, -inf }
 0x330   :  { %508 = vmax.xlane.f32.xlu2 %v507_v20  ;;  %573 = vmax.xlane.f32.xlu1 %v572_v16 }
 0x334   :  { %v634_v21 = vpop.f32.mrf.mxu2 }
 0x335   :  { %v635_v33 = vadd.f32 %v634_v21, %v332_v17 }
 0x337   :  { %v637_v34 = vsel %vm129_vm1, %v635_v33, -inf }
 0x338   :  { %638 = vmax.xlane.f32.xlu0 %v637_v34 }
 0x348   :  { %372 = vrot.lane.b32.xlu2 %v1013_v5, %s962_s20 }
 0x34c   :  { %453 = vrot.lane.b32.xlu0 %v1043_v22, %s959_s16 }
 0x39a   :  { %v444_v31 = vpop.xlane.xlu0 %443 }
 0x39b   :  { %v363_v30 = vpop.xlane.xlu1 %362  ;;  %v445_v35 = vsub.f32 %v440_v23, %v444_v31  ;;  %v690_v23 = vld [vmem:[#allocation8 + $0x8] sm:$0xff] }
 0x39c   :  { %v364_v36 = vsub.f32 %v359_v24, %v363_v30  ;;  %713 = vmatpush.msrb.mxu3 %v690_v23 }
 0x39d   :  { %v446_v37 = vmul.f32 1.442695, %v445_v35 }
 0x39e   :  { %v365_v38 = vmul.f32 1.442695, %v364_v36  ;;  %714 = vmatpush.msrb.mxu3 %v689_v26 }
 0x39f   :  { %809 = vpow2.f32 %v446_v37 }
 0x3a0   :  { %811 = vpow2.f32 %v365_v38 }
 0x3a3   :  { %v509_v39 = vpop.xlane.xlu2 %508  ;;  %v574_v40 = vpop.xlane.xlu1 %573 }
 0x3a4   :  { %v510_v41 = vsub.f32 %v505_v32, %v509_v39  ;;  %v575_v42 = vsub.f32 %v570_v29, %v574_v40 }
 0x3a5   :  { %v810_v43 = vpop.eup %809 }
 0x3a6   :  { %v812_v44 = vpop.eup %811  ;;  %v511_v45 = vmul.f32 1.442695, %v510_v41  ;;  %v576_v46 = vmul.f32 1.442695, %v575_v42  ;;  %v448_v5 = vsel %vm129_vm1, %v810_v43, 0.0 }
 0x3a7   :  { %v367_v47 = vsel %vm129_vm1, %v812_v44, 0.0  ;;  %449 = vadd.xlane.f32.xlu1 %v448_v5 }
 0x3a8   :  { %813 = vpow2.f32 %v511_v45  ;;  %368 = vadd.xlane.f32.xlu2 %v367_v47 }
 0x3a9   :  { %815 = vpow2.f32 %v576_v46 }
 0x3ab   :  { %v373_v48 = vpop.permute.xlu2 %372  ;;  %v639_v49 = vpop.xlane.xlu0 %638 }
 0x3ac   :  { %v640_v50 = vsub.f32 %v635_v33, %v639_v49  ;;  %393 = vmatpush.msra.mxu1 %v373_v48 }
 0x3ae   :  { %v814_v51 = vpop.eup %813  ;;  %v641_v52 = vmul.f32 1.442695, %v640_v50 }
 0x3af   :  { %v816_v53 = vpop.eup %815  ;;  %v513_v54 = vsel %vm129_vm1, %v814_v51, 0.0 }
 0x3b0   :  { %817 = vpow2.f32 %v641_v52  ;;  %514 = vadd.xlane.f32.xlu0 %v513_v54  ;;  %v578_v55 = vsel %vm129_vm1, %v816_v53, 0.0 }
 0x3b1   :  { %579 = vadd.xlane.f32.xlu1 %v578_v55 }
 0x3b6   :  { %v818_v56 = vpop.eup %817 }
 0x3b7   :  { %v643_v57 = vsel %vm129_vm1, %v818_v56, 0.0 }
 0x3b9   :  { %644 = vadd.xlane.f32.xlu1 %v643_v57 }
 0x3be   :  { %v454_v58 = vpop.permute.xlu0 %453 }
 0x3bf   :  { %474 = vmatpush.msra.mxu0 %v454_v58 }
 0x3c0   :  { %583 = vrot.lane.b32.xlu2 %v1043_v22, %s960_s17 }
 0x3c4   :  { %648 = vrot.lane.b32.xlu0 %v1043_v22, %s962_s20 }
 0x3c8   :  { %399 = vrot.lane.b32.xlu2 %v1102_v14, %s947_s24 }
 0x3cc   :  { %403 = vrot.lane.b32.xlu0 %v1100_v13, %s963_s21 }
 0x3d2   :  { %518 = vrot.lane.b32.xlu1 %v1043_v22, %s958_s15 }
 0x41a   :  { %v450_v59 = vpop.xlane.xlu1 %449 }
 0x41b   :  { %v369_v60 = vpop.xlane.xlu2 %368  ;;  %819 = vrcp.f32 %v450_v59 }
 0x41c   :  { %821 = vrcp.f32 %v369_v60 }
 0x421   :  { %v820_v61 = vpop.eup %819 }
 0x422   :  { %v822_v62 = vpop.eup %821  ;;  %v452_v63 = vmul.f32 %v820_v61, %v810_v43 }
 0x423   :  { %v371_v0 = vmul.f32 %v822_v62, %v812_v44  ;;  %v584_v1 = vpop.permute.xlu2 %583  ;;  %v515_v22 = vpop.xlane.xlu0 %514 }
 0x424   :  { %v580_v2 = vpop.xlane.xlu1 %579  ;;  %604 = vmatpush.msrb.mxu0 %v584_v1 }
 0x425   :  { %823 = vrcp.f32 %v580_v2  ;;  %761 = vmatmul.msk.f32.vlgmr.msra.gmra.mxu1 %vm129_vm1, %v371_v0  ;;  %764 = vmatmul.msk.f32.vlgmr.msra.gmra.mxu0 %vm129_vm1, %v452_v63 }
 0x426   :  { %825 = vrcp.f32 %v515_v22 }
 0x42b   :  { %v824_v3 = vpop.eup %823  ;;  %v400_v27 = vpop.permute.xlu2 %399 }
 0x42c   :  { %v582_v4 = vmul.f32 %v824_v3, %v816_v53  ;;  %v645_v6 = vpop.xlane.xlu1 %644  ;;  %v826_v7 = vpop.eup %825  ;;  %v410_v29 = vsel %vm129_vm1, %v1098_v11, %v400_v27 }
 0x42d   :  { %827 = vrcp.f32 %v645_v6  ;;  %v517_v8 = vmul.f32 %v826_v7, %v814_v51 }
 0x42e   :  { %770 = vmatmul.msk.f32.vlgmr.msrb.gmra.mxu0 %vm129_vm1, %v582_v4 }
 0x433   :  { %v828_v12 = vpop.eup %827 }
 0x434   :  { %v647_v13 = vmul.f32 %v828_v12, %v818_v56 }
 0x436   :  { %v649_v10 = vpop.permute.xlu0 %648 }
 0x43e   :  { %v404_v28 = vpop.permute.xlu0 %403 }
 0x43f   :  { %v412_v32 = vsel %vm411_vm3, %v410_v29, %v404_v28 }
 0x444   :  { %v519_v9 = vpop.permute.xlu1 %518 }
 0x445   :  { %539 = vmatpush.msrb.mxu1 %v519_v9 }
 0x446   :  { %767 = vmatmul.msk.f32.vlgmr.msrb.gmra.mxu1 %vm129_vm1, %v517_v8 }
 0x447   :  { %669 = vmatpush.msra.mxu1 %v649_v10 }
 0x44e   :  { %773 = vmatmul.msk.f32.vlgmr.msra.gmra.mxu1 %vm129_vm1, %v647_v13 }
 0x4a2   :  { %v395_v14 = vpop.f32.mrf.mxu1  ;;  %v476_v15 = vpop.f32.mrf.mxu0 }
 0x4a3   :  { %407 = vrot.lane.b32.xlu2 %v395_v14, %s964_s22 }
 0x4ab   :  { %v606_v17 = vpop.f32.mrf.mxu0 }
 0x4ac   :  { %679 = vrot.lane.b32.xlu1 %v606_v17, %s963_s21 }
 0x4c3   :  { %v541_v24 = vpop.f32.mrf.mxu1 }
 0x4c4   :  { %675 = vrot.lane.b32.xlu0 %v541_v24, %s947_s24 }
 0x4cb   :  { %v671_v25 = vpop.f32.mrf.mxu1 }
 0x4cc   :  { %683 = vrot.lane.b32.xlu2 %v671_v25, %s964_s22 }
 0x4fd   :  { %v408_v16 = vpop.permute.xlu2 %407 }
 0x4fe   :  { %v414_v20 = vsel %vm413_vm4, %v412_v32, %v408_v16 }
 0x4ff   :  { %774 = vmatmul.msk.f32.vlgmr.msrb.gmra.mxu3 %vm84_vm0, %v414_v20 }
 0x51e   :  { %v680_v33 = vpop.permute.xlu1 %679 }
 0x526   :  { %v684_v31 = vpop.permute.xlu2 %683 }
 0x536   :  { %v676_v21 = vpop.permute.xlu0 %675 }
 0x537   :  { %v686_v34 = vsel %vm129_vm1, %v476_v15, %v676_v21 }
 0x538   :  { %v687_v30 = vsel %vm411_vm3, %v686_v34, %v680_v33 }
 0x539   :  { %v688_v35 = vsel %vm413_vm4, %v687_v30, %v684_v31 }
 0x53a   :  { %775 = vmatmul.msk.f32.gmra.mxu3 %vm84_vm0, %v688_v35 }
 0x582   :  { %v716_v36 = vpop.f32.mrf.mxu3 }
 0x583   :  { %722 = vst.msk [vmem:[#allocation10] sm:$0xff] %vm84_vm0, %v716_v36 }
 0x5bd   :  { %v719_v11 = vpop.f32.mrf.mxu3 }
 0x5be   :  { %723 = vst.msk [vmem:[#allocation10 + $0x8] sm:$0xff] %vm84_vm0, %v719_v11 }
 0x5bf   :  { %736 = dma.vmem_to_hbm [thread:$0]  %s729_s26, 256, %s731_s1, [#allocation4], %s946_s23, %s946_s23, %s947_s24  }
 0x5c0   :  { %943 = dma.done.wait [#allocation4], 256  }
 0x5c1   :  { %944 = vsyncadd [#allocation4], 4294967040 }
 0x5c2   :  { %741 = vsyncpa [#allocation3], 1 }
 0x5c3   :  { %742 = vsyncpa [#allocation7], 1 }
 0x5c4   :  { %743 = vsyncpa [#allocation4], 1 }
 0x5c5   :  { %744 = vsyncpa [#allocation5], 1 }

</bundles_post_ra>
